<compile_context>
chip_gen: v7x
topology: tpu7x:2x2x1
jax: 0.10.0
libtpu: 0.0.40
codegen_flags: <defaults>
</compile_context>

<pallas_src>
import math
import functools

import jax
import jax.numpy as jnp
from jax import lax
from jax.experimental import pallas as pl
from jax.experimental.pallas import tpu as pltpu


# Large finite negative for masked scores: keeps the online softmax NaN-free
# (exp args always <= 0) while exp(mask - real_max) underflows to exactly 0.
MASK_VALUE = -0.7 * float(jnp.finfo(jnp.float32).max)

_VMEM_LIMIT = 64 * 1024 * 1024  # headroom over scoped defaults; usage ~6 MiB


def _pick_tile(dim, target, align):
    """Largest tile <= target that divides `dim` and is a multiple of `align`.
    Falls back to the full dim (full-extent blocks are always (8,128)-legal)."""
    if dim <= target:
        return dim
    t = (target // align) * align
    while t >= align:
        if dim % t == 0:
            return t
        t -= align
    return dim


# ---------------------------------------------------------------------------
# Kernel 1: tiled dense projection  y = x @ W + b
# ---------------------------------------------------------------------------
def _linear_kernel(x_ref, w_ref, b_ref, o_ref, acc_ref, *, compute_dtype):
    @pl.when(pl.program_id(2) == 0)
    def _():
        acc_ref[...] = jnp.zeros(acc_ref.shape, acc_ref.dtype)

    acc_ref[...] += jnp.dot(
        x_ref[...].astype(compute_dtype),       # no-op when already bf16
        w_ref[...].astype(compute_dtype),
        preferred_element_type=jnp.float32,
    )

    @pl.when(pl.program_id(2) == pl.num_programs(2) - 1)
    def _():
        o_ref[...] = (acc_ref[...] + b_ref[...]).astype(o_ref.dtype)


def linear(x2d, w, b, *, compute_dtype=jnp.bfloat16, out_dtype=None,
           tm=512, tn=512, tk=1024):
    """x2d: (M, E_in), w: (E_in, E_out), b: (E_out,) -> (M, E_out)."""
    M, Kdim = x2d.shape
    N = w.shape[1]
    out_dtype = out_dtype or compute_dtype

    tm = _pick_tile(M, tm, 8)       # sublane-aligned
    tn = _pick_tile(N, tn, 128)     # lane-aligned (unmasked stores)
    tk = _pick_tile(Kdim, tk, 128)

    grid = (M // tm, N // tn, Kdim // tk)
    kernel = functools.partial(_linear_kernel, compute_dtype=compute_dtype)

    return pl.pallas_call(
        kernel,
        out_shape=jax.ShapeDtypeStruct((M, N), out_dtype),
        grid=grid,
        in_specs=[
            pl.BlockSpec((tm, tk), lambda i, j, k: (i, k)),
            pl.BlockSpec((tk, tn), lambda i, j, k: (k, j)),
            pl.BlockSpec((1, tn), lambda i, j, k: (0, j)),
        ],
        out_specs=pl.BlockSpec((tm, tn), lambda i, j, k: (i, j)),
        scratch_shapes=[pltpu.VMEM((tm, tn), jnp.float32)],
        compiler_params=pltpu.CompilerParams(
            dimension_semantics=("parallel", "parallel", "arbitrary"),
            vmem_limit_bytes=_VMEM_LIMIT,
        ),
    )(x2d, w, b.reshape(1, N).astype(jnp.float32))


# ---------------------------------------------------------------------------
# Kernel 2: flash-style scaled dot-product attention
#   grid = (B*H, Lq//tq, Lkv//tkv), online softmax over the KV axis.
#   Q arrives pre-scaled by 1/sqrt(d) (folded into Wq off the hot path).
# ---------------------------------------------------------------------------
def _flash_attention_kernel(*refs, use_mask, compute_dtype):
    if use_mask:
        q_ref, k_ref, v_ref, mask_ref, o_ref, m_sc, l_sc, acc_sc = refs
    else:
        q_ref, k_ref, v_ref, o_ref, m_sc, l_sc, acc_sc = refs
        mask_ref = None

    ki = pl.program_id(2)

    @pl.when(ki == 0)
    def _():
        m_sc[...] = jnp.full(m_sc.shape, MASK_VALUE, m_sc.dtype)
        l_sc[...] = jnp.zeros(l_sc.shape, l_sc.dtype)
        acc_sc[...] = jnp.zeros(acc_sc.shape, acc_sc.dtype)

    q = q_ref[0]                                           # (tq, d), bf16/f32
    k = k_ref[0]                                           # (tkv, d)

    # QK^T by contracting the last dims directly -> no K-tile transpose.
    s = lax.dot_general(
        q, k, (((1,), (1,)), ((), ())), preferred_element_type=jnp.float32
    )                                                      # (tq, tkv) f32

    if use_mask:
        s = jnp.where(mask_ref[0, 0] == 0, MASK_VALUE, s)

    m_prev = m_sc[...]                                     # (tq, 1)
    m_new = jnp.maximum(m_prev, jnp.max(s, axis=-1, keepdims=True))
    alpha = jnp.exp(m_prev - m_new)                        # <= 1, finite
    p = jnp.exp(s - m_new)                                 # <= 1, finite

    l_sc[...] = alpha * l_sc[...] + jnp.sum(p, axis=-1, keepdims=True)
    acc_sc[...] = alpha * acc_sc[...] + jnp.dot(
        p.astype(compute_dtype), v_ref[0], preferred_element_type=jnp.float32
    )
    m_sc[...] = m_new

    @pl.when(ki == pl.num_programs(2) - 1)
    def _():
        # NOTE: rows fully masked across all KV tiles yield mean(V) (flash
        # convention) instead of the reference's NaN — documented behavior.
        inv_l = pl.reciprocal(l_sc[...], approx=True)      # EUP slot, off VALU
        o_ref[0] = (acc_sc[...] * inv_l).astype(o_ref.dtype)


def flash_attention(q, k, v, mask=None, *, num_heads, out_dtype=jnp.float32,
                    q_tile=512, kv_tile=1024):
    """q: (B*H, Lq, d); k, v: (B*H, Lkv, d); mask: None or (B, 1|H, Lq, Lkv) int8.
    Q must already carry the 1/sqrt(d) scale."""
    BH, Lq, d = q.shape
    Lkv = k.shape[1]
    compute_dtype = q.dtype
    use_mask = mask is not None

    # q-tile 32-aligned when a (sublane-packed) int8 mask tile is DMA'd.
    tq = _pick_tile(Lq, q_tile, 32 if use_mask else 8)
    tkv = _pick_tile(Lkv, kv_tile, 128)
    grid = (BH, Lq // tq, Lkv // tkv)   # B*H first & parallel (megacore shard)

    in_specs = [
        pl.BlockSpec((1, tq, d), lambda bh, qi, ki: (bh, qi, 0)),
        pl.BlockSpec((1, tkv, d), lambda bh, qi, ki: (bh, ki, 0)),
        pl.BlockSpec((1, tkv, d), lambda bh, qi, ki: (bh, ki, 0)),
    ]
    args = [q, k, v]

    if use_mask:
        # Broadcast over heads purely in the index_map — the (B*H, L, L) mask
        # is never materialized; the no-mask path carries no mask input at all.
        if mask.shape[1] == 1:
            mask_map = lambda bh, qi, ki: (bh // num_heads, 0, qi, ki)
        else:
            mask_map = lambda bh, qi, ki: (bh // num_heads, bh % num_heads, qi, ki)
        in_specs.append(pl.BlockSpec((1, 1, tq, tkv), mask_map))
        args.append(mask)

    kernel = functools.partial(
        _flash_attention_kernel, use_mask=use_mask, compute_dtype=compute_dtype
    )

    return pl.pallas_call(
        kernel,
        out_shape=jax.ShapeDtypeStruct((BH, Lq, d), out_dtype),
        grid=grid,
        in_specs=in_specs,
        out_specs=pl.BlockSpec((1, tq, d), lambda bh, qi, ki: (bh, qi, 0)),
        scratch_shapes=[
            pltpu.VMEM((tq, 1), jnp.float32),   # running max m
            pltpu.VMEM((tq, 1), jnp.float32),   # running sum l
            pltpu.VMEM((tq, d), jnp.float32),   # running weighted-V acc
        ],
        compiler_params=pltpu.CompilerParams(
            dimension_semantics=("parallel", "parallel", "arbitrary"),
            vmem_limit_bytes=_VMEM_LIMIT,
        ),
    )(*args)


# ---------------------------------------------------------------------------
# Parameter init / one-time weight prep (off the forward hot path)
# ---------------------------------------------------------------------------
def init_mha_params(key, embed_dim):
    """Raw f32 weights mimicking nn.Linear's uniform(-1/sqrt(fan_in), ...)."""
    bound = 1.0 / math.sqrt(embed_dim)
    keys = jax.random.split(key, 8)

    def lin(kw, kb):
        w = jax.random.uniform(kw, (embed_dim, embed_dim), jnp.float32, -bound, bound)
        b = jax.random.uniform(kb, (embed_dim,), jnp.float32, -bound, bound)
        return w, b

    return {
        "q": lin(keys[0], keys[1]),
        "k": lin(keys[2], keys[3]),
        "v": lin(keys[4], keys[5]),
        "o": lin(keys[6], keys[7]),   # initialized but unused by the reference forward
    }


def prepare_mha_params(params, num_heads, compute_dtype=jnp.bfloat16):
    """One-time prep: fold 1/sqrt(head_dim) into Wq/bq, cast matmul operands
    to the MXU compute dtype, and pre-concatenate the fused (E, 3E) QKV weight."""
    wq, bq = params["q"]
    wk, bk = params["k"]
    wv, bv = params["v"]
    E = wq.shape[0]
    head_dim = E // num_heads
    scale = 1.0 / math.sqrt(head_dim)

    wq_s, bq_s = wq * scale, bq * scale
    return {
        "num_heads": num_heads,
        "compute_dtype": compute_dtype,
        "wq": wq_s.astype(compute_dtype), "bq": bq_s,
        "wk": wk.astype(compute_dtype),   "bk": bk,
        "wv": wv.astype(compute_dtype),   "bv": bv,
        "w_qkv": jnp.concatenate([wq_s, wk, wv], axis=1).astype(compute_dtype),
        "b_qkv": jnp.concatenate([bq_s, bk, bv], axis=0),
    }


# ---------------------------------------------------------------------------
# MultiHeadAttention forward (glue in plain JAX, hot paths in Pallas)
# ---------------------------------------------------------------------------
def multi_head_attention(prepared, Q, K, V, mask=None):
    """Q: (B, Lq, E); K, V: (B, Lkv, E); mask: None, (B, L, L) or (B, h, L, L)."""
    B, Lq, E = Q.shape
    Lkv = K.shape[1]
    H = prepared["num_heads"]
    d = E // H
    cdt = prepared["compute_dtype"]

    if (Q is K) and (K is V):
        # Self-attention: single read of the activation slab against the
        # pre-concatenated (E, 3E) weight -> 3x wider MXU N per step.
        x = Q.reshape(B * Lq, E).astype(cdt)
        y = linear(x, prepared["w_qkv"], prepared["b_qkv"],
                   compute_dtype=cdt, out_dtype=cdt)            # (B*Lq, 3E)
        # single reshape+transpose for all three heads-major tensors
        qkv = y.reshape(B, Lq, 3, H, d).transpose(2, 0, 3, 1, 4)
        qkv = qkv.reshape(3, B * H, Lq, d)
        q, k, v = qkv[0], qkv[1], qkv[2]
    else:
        q2d = linear(Q.reshape(B * Lq, E).astype(cdt), prepared["wq"],
                     prepared["bq"], compute_dtype=cdt, out_dtype=cdt)
        k2d = linear(K.reshape(B * Lkv, E).astype(cdt), prepared["wk"],
                     prepared["bk"], compute_dtype=cdt, out_dtype=cdt)
        v2d = linear(V.reshape(B * Lkv, E).astype(cdt), prepared["wv"],
                     prepared["bv"], compute_dtype=cdt, out_dtype=cdt)

        def split_heads(x2d, L):
            # single XLA transpose (no split-copies)
            return x2d.reshape(B, L, H, d).transpose(0, 2, 1, 3).reshape(B * H, L, d)

        q, k, v = split_heads(q2d, Lq), split_heads(k2d, Lkv), split_heads(v2d, Lkv)

    mask_i8 = None
    if mask is not None:
        if mask.ndim == 3:
            mask = mask[:, None, :, :]                          # (B, 1, L, L)
        mask_i8 = (mask != 0).astype(jnp.int8)                  # 4x fewer DMA bytes

    attn = flash_attention(q, k, v, mask_i8, num_heads=H,
                           out_dtype=jnp.float32)               # (B*H, Lq, d)

    # combine heads: (B*H, Lq, d) -> (B, Lq, E)
    out = attn.reshape(B, H, Lq, d).transpose(0, 2, 1, 3).reshape(B, Lq, E)

    # NOTE: the reference PyTorch forward never applies output_projection,
    # so we stop after combining heads to match its semantics exactly.
    return out


# ---------------------------------------------------------------------------
# Pure-JAX reference for sanity checking
# ---------------------------------------------------------------------------
def mha_reference(params, Q, K, V, num_heads, mask=None):
    B, L, E = Q.shape
    hd = E // num_heads

    def proj(x, wb):
        w, b = wb
        return x @ w + b

    def split(x):
        return x.reshape(B, -1, num_heads, hd).transpose(0, 2, 1, 3)

    q = split(proj(Q, params["q"]))
    k = split(proj(K, params["k"]))
    v = split(proj(V, params["v"]))
    scores = jnp.einsum("bhld,bhmd->bhlm", q, k) / math.sqrt(hd)
    if mask is not None:
        if mask.ndim == 3:
            mask = mask[:, None, :, :]
        scores = jnp.where(mask == 0, -jnp.inf, scores)
    p = jax.nn.softmax(scores, axis=-1)
    out = jnp.einsum("bhlm,bhmd->bhld", p, v)
    return out.transpose(0, 2, 1, 3).reshape(B, L, E)


if __name__ == "__main__":
    B, L, E, H = 2, 8, 32, 4

    key = jax.random.PRNGKey(0)
    kq, kk, kv, kp = jax.random.split(key, 4)
    Q = jax.random.normal(kq, (B, L, E), jnp.float32)
    K = jax.random.normal(kk, (B, L, E), jnp.float32)
    V = jax.random.normal(kv, (B, L, E), jnp.float32)
    params = init_mha_params(kp, E)

    # causal mask (B, L, L); the module broadcasts it over heads
    causal = jnp.tril(jnp.ones((L, L), jnp.float32))
    mask = jnp.broadcast_to(causal, (B, L, L))

    prepared = prepare_mha_params(params, H)                        # bf16 default
    prepared_f32 = prepare_mha_params(params, H, compute_dtype=jnp.float32)

    # masked / unmasked cross-attention style (distinct Q, K, V)
    out_masked = jax.block_until_ready(multi_head_attention(prepared, Q, K, V, mask=mask))
    out_nomask = jax.block_until_ready(multi_head_attention(prepared, Q, K, V, mask=None))
    # self-attention (same activation -> fused (E, 3E) QKV projection path)
    out_selfattn = jax.block_until_ready(multi_head_attention(prepared, Q, Q, Q, mask=mask))
    # f32 MXU operands (accuracy check of the kernel structure itself)
    out_f32 = jax.block_until_ready(multi_head_attention(prepared_f32, Q, K, V, mask=mask))

    ref_masked = mha_reference(params, Q, K, V, H, mask=mask)
    ref_nomask = mha_reference(params, Q, K, V, H, mask=None)
    ref_selfattn = mha_reference(params, Q, Q, Q, H, mask=mask)

    assert out_masked.shape == (B, L, E)
    assert jnp.allclose(out_masked, ref_masked, atol=3e-2, rtol=3e-2)
    assert jnp.allclose(out_nomask, ref_nomask, atol=3e-2, rtol=3e-2)
    assert jnp.allclose(out_selfattn, ref_selfattn, atol=3e-2, rtol=3e-2)
    assert jnp.allclose(out_f32, ref_masked, atol=5e-3, rtol=5e-3)

    print("KERNEL_OK")
</pallas_src>

<mosaic_0001>
module attributes {stable_mosaic.version = 11 : i64} {
  func.func @_linear_kernel(%arg0: i32, %arg1: i32, %arg2: i32, %arg3: memref<16x32xbf16, #tpu.memory_space<vmem>>, %arg4: memref<32x32xbf16, #tpu.memory_space<vmem>>, %arg5: memref<1x32xf32, #tpu.memory_space<vmem>>, %arg6: memref<16x32xbf16, #tpu.memory_space<vmem>>, %arg7: memref<16x32xf32, #tpu.memory_space<vmem>>) attributes {dimension_semantics = [#tpu.dimension_semantics<parallel>, #tpu.dimension_semantics<parallel>, #tpu.dimension_semantics<arbitrary>], iteration_bounds = array<i64: 1, 1, 1>, scalar_prefetch = 0 : i64, scratch_operands = 1 : i64, tpu.core_type = #tpu.core_type<tc>, window_params = [{transform_indices = @transform_0, window_bounds = array<i64: 16, 32>}, {transform_indices = @transform_1, window_bounds = array<i64: 32, 32>}, {transform_indices = @transform_2, window_bounds = array<i64: 1, 32>}, {transform_indices = @transform_3, window_bounds = array<i64: 16, 32>}]} {
    %c0_i32 = arith.constant 0 : i32
    %0 = arith.cmpi eq, %arg2, %c0_i32 : i32
    %1 = arith.extui %0 : i1 to i32
    %c0_i32_0 = arith.constant 0 : i32
    %2 = arith.cmpi ne, %1, %c0_i32_0 : i32
    scf.if %2 {
      %cst_10 = arith.constant 0.000000e+00 : f32
      %12 = vector.broadcast %cst_10 : f32 to vector<16x32xf32>
      %c0_11 = arith.constant 0 : index
      %c0_12 = arith.constant 0 : index
      %13 = vector.load %arg7[%c0_11, %c0_12] : memref<16x32xf32, #tpu.memory_space<vmem>>, vector<16x32xf32>
      tpu.vector_store %arg7[%c0_11, %c0_12], %12 {strides = array<i32>} : memref<16x32xf32, #tpu.memory_space<vmem>>, vector<16x32xf32>,
    } else {
    }
    %c0 = arith.constant 0 : index
    %c0_1 = arith.constant 0 : index
    %3 = vector.load %arg7[%c0, %c0_1] : memref<16x32xf32, #tpu.memory_space<vmem>>, vector<16x32xf32>
    %c0_2 = arith.constant 0 : index
    %c0_3 = arith.constant 0 : index
    %4 = vector.load %arg3[%c0_2, %c0_3] : memref<16x32xbf16, #tpu.memory_space<vmem>>, vector<16x32xbf16>
    %c0_4 = arith.constant 0 : index
    %c0_5 = arith.constant 0 : index
    %5 = vector.load %arg4[%c0_4, %c0_5] : memref<32x32xbf16, #tpu.memory_space<vmem>>, vector<32x32xbf16>
    %cst = arith.constant dense<0.000000e+00> : vector<16x32xf32>
    %6 = tpu.matmul %4, %5, %cst {dimension_numbers = #tpu.dot_dimension_numbers<[1], [0], [0], [1], [0, 0, 1, 1], [], []>} : vector<16x32xbf16>, vector<32x32xbf16>, vector<16x32xf32> -> vector<16x32xf32>
    %7 = arith.addf %3, %6 : vector<16x32xf32>
    %c0_6 = arith.constant 0 : index
    %c0_7 = arith.constant 0 : index
    %8 = vector.load %arg7[%c0_6, %c0_7] : memref<16x32xf32, #tpu.memory_space<vmem>>, vector<16x32xf32>
    tpu.vector_store %arg7[%c0_6, %c0_7], %7 {strides = array<i32>} : memref<16x32xf32, #tpu.memory_space<vmem>>, vector<16x32xf32>,
    %c0_i32_8 = arith.constant 0 : i32
    %9 = arith.cmpi eq, %arg2, %c0_i32_8 : i32
    %10 = arith.extui %9 : i1 to i32
    %c0_i32_9 = arith.constant 0 : i32
    %11 = arith.cmpi ne, %10, %c0_i32_9 : i32
    scf.if %11 {
      %c0_10 = arith.constant 0 : index
      %c0_11 = arith.constant 0 : index
      %12 = vector.load %arg7[%c0_10, %c0_11] : memref<16x32xf32, #tpu.memory_space<vmem>>, vector<16x32xf32>
      %c0_12 = arith.constant 0 : index
      %c0_13 = arith.constant 0 : index
      %13 = vector.load %arg5[%c0_12, %c0_13] : memref<1x32xf32, #tpu.memory_space<vmem>>, vector<1x32xf32>
      %14 = vector.broadcast %13 : vector<1x32xf32> to vector<16x32xf32>
      %15 = arith.addf %12, %14 : vector<16x32xf32>
      %16 = arith.truncf %15 : vector<16x32xf32> to vector<16x32xbf16>
      %c0_14 = arith.constant 0 : index
      %c0_15 = arith.constant 0 : index
      %17 = vector.load %arg6[%c0_14, %c0_15] : memref<16x32xbf16, #tpu.memory_space<vmem>>, vector<16x32xbf16>
      tpu.vector_store %arg6[%c0_14, %c0_15], %16 {strides = array<i32>} : memref<16x32xbf16, #tpu.memory_space<vmem>>, vector<16x32xbf16>,
    } else {
    }
    return
  }
  func.func @transform_0(%arg0: i32, %arg1: i32, %arg2: i32) -> (i32, i32) {
    %c0_i32 = arith.constant 0 : i32
    return %arg0, %arg2 : i32, i32
  }
  func.func @transform_1(%arg0: i32, %arg1: i32, %arg2: i32) -> (i32, i32) {
    %c0_i32 = arith.constant 0 : i32
    return %arg2, %arg1 : i32, i32
  }
  func.func @transform_2(%arg0: i32, %arg1: i32, %arg2: i32) -> (i32, i32) {
    %c0_i32 = arith.constant 0 : i32
    %c0_i32_0 = arith.constant 0 : i32
    return %c0_i32, %arg1 : i32, i32
  }
  func.func @transform_3(%arg0: i32, %arg1: i32, %arg2: i32) -> (i32, i32) {
    %c0_i32 = arith.constant 0 : i32
    return %arg0, %arg1 : i32, i32
  }
}

</mosaic_0001>

<bundles_post_ra>
// kernel: tpu_custom_call.1
= control target key start
LH: loop header
LB: loop body
LE: loop exit
PB: predicated region body
PF: predicated region fallthrough
CT: control target
= control target key end

     0   :  { %8 = vsyncpa [#allocation4], 0  ;;  %s401_s0 = inlined_call_operand.hbm [shape: bf16[16,32], index: 0, kind: input, shape index: {}]   ;;  %s402_s1 = inlined_call_operand.hbm [shape: bf16[32,32], index: 1, kind: input, shape index: {}]   ;;  %s403_s2 = inlined_call_operand.hbm [shape: f32[1,32], index: 2, kind: input, shape index: {}]   ;;  %s404_s3 = inlined_call_operand.hbm [shape: bf16[16,32], index: 3, kind: output, shape index: {}]  }
   0x1   :  { %9 = vsyncpa [#allocation7], 0 }
   0x2   :  { %10 = vsyncpa [#allocation5], 0  ;;  %s304_s12 = smov [#allocation6]   ;;  %s305_s14 = smov [#allocation3]  }
   0x3   :  { %s28_s13 = sshll.u32 %s304_s12, 4  ;;  %s16_s15 = sshll.u32 %s305_s14, 4  ;;  %s29_s13 = int_to_ptr.vmem [resolvable:$true] %s28_s13  ;;  %s332_s15 = int_to_ptr.vmem [resolvable:$true] %s16_s15 }
   0x4   :  { %s210_s18 = scalar_lea.hbm %s402_s1, 256 }
   0x5   :  { %p211_p0 = scmp.ne.s32.totalorder %s402_s1, %s210_s18  ;;  %p214_p1 = scmp.lt.u32.totalorder %s210_s18, %s402_s1 }
   0x7   :  { %p216_p2 = pnand %p214_p1, %p211_p0 }
   0x9   :  { %219 = shalt.err (!%p216_p2)
}
   0xa   :  { %s220_s23 = scalar_lea.vmem %s29_s13, 256  ;;  %p225_p4 = scmp.lt.s32.totalorder %s29_s13, %s29_s13 }
   0xb   :  { %p221_p3 = scmp.ne.s32.totalorder %s29_s13, %s220_s23  ;;  %p226_p5 = scmp.lt.s32.totalorder %s220_s23, %s220_s23 }
   0xd   :  { %p227_p6 = por %p226_p5, %p225_p4 }
   0xf   :  { %p228_p7 = pnand %p227_p6, %p221_p3 }
  0x11   :  { %231 = shalt.err (!%p228_p7)
}
  0x12   :  { %s306_s24 = smov 64   ;;  %s307_s25 = smov 4  }
  0x13   :  { %34 = dma.hbm_to_vmem [thread:$0]  %s402_s1, 256, %s29_s13, [#allocation7], %s306_s24, %s306_s24, %s307_s25  }
  0x14   :  { %s232_s30 = scalar_lea.hbm %s401_s0, 128 }
  0x15   :  { %p233_p8 = scmp.ne.s32.totalorder %s401_s0, %s232_s30  ;;  %p236_p9 = scmp.lt.u32.totalorder %s232_s30, %s401_s0 }
  0x17   :  { %p238_p10 = pnand %p236_p9, %p233_p8 }
  0x19   :  { %241 = shalt.err (!%p238_p10)
}
  0x1a   :  { %s242_s8 = scalar_lea.vmem %s332_s15, 128  ;;  %p247_p12 = scmp.lt.s32.totalorder %s332_s15, %s332_s15 }
  0x1b   :  { %p243_p11 = scmp.ne.s32.totalorder %s332_s15, %s242_s8  ;;  %p248_p13 = scmp.lt.s32.totalorder %s242_s8, %s242_s8 }
  0x1d   :  { %p249_p0 = por %p248_p13, %p247_p12 }
  0x1f   :  { %p250_p1 = pnand %p249_p0, %p243_p11 }
  0x21   :  { %253 = shalt.err (!%p250_p1)
}
  0x22   :  { %22 = dma.hbm_to_vmem [thread:$0]  %s401_s0, 128, %s332_s15, [#allocation4], %s306_s24, %s306_s24, %s307_s25  }
  0x23   :  { %s308_s10 = smov [#allocation8]   ;;  %s254_s14 = scalar_lea.hbm %s403_s2, 16 }
  0x24   :  { %s41_s11 = sshll.u32 %s308_s10, 4  ;;  %p255_p2 = scmp.ne.s32.totalorder %s403_s2, %s254_s14  ;;  %s42_s11 = int_to_ptr.vmem [resolvable:$true] %s41_s11 }
  0x25   :  { %p258_p3 = scmp.lt.u32.totalorder %s254_s14, %s403_s2 }
  0x27   :  { %p260_p4 = pnand %p258_p3, %p255_p2 }
  0x29   :  { %263 = shalt.err (!%p260_p4)
}
  0x2a   :  { %s264_s20 = scalar_lea.vmem %s42_s11, 16  ;;  %s268_s0 = scalar_lea.vmem %s42_s11, 32 }
  0x2b   :  { %p265_p5 = scmp.ne.s32.totalorder %s42_s11, %s264_s20  ;;  %p269_p6 = scmp.lt.s32.totalorder %s42_s11, %s42_s11 }
  0x2c   :  { %p270_p7 = scmp.lt.s32.totalorder %s268_s0, %s264_s20 }
  0x2e   :  { %p271_p8 = por %p270_p7, %p269_p6 }
  0x30   :  { %p272_p9 = pnand %p271_p8, %p265_p5 }
  0x32   :  { %275 = shalt.err (!%p272_p9)
}
  0x33   :  { %44 = dma.hbm_to_vmem [thread:$0]  %s403_s2, 16, %s42_s11, [#allocation7]  }
  0x34   :  { %298 = dma.done.wait [#allocation4], 128  }
  0x35   :  { %299 = vsyncadd [#allocation4], 4294967168 }
  0x36   :  { %300 = dma.done.wait [#allocation7], 272  }
  0x37   :  { %301 = vsyncadd [#allocation7], 4294967024  ;;  %vm59_vm0 = vcmask 261120   ;;  %v309_v0 = vmov 0.0   ;;  %vm310_vm1 = vmmov 0   ;;  %v207_v1 = vld [vmem:[#allocation6] sm:$0xff]  }
  0x38   :  { %191 = vmatprep.subr.bf16.mxu0 %v309_v0  ;;  %195 = vmatprep.mubr.msk.bf16.mxu0 %vm310_vm1, %v309_v0  ;;  %60 = vst.msk [vmem:[#allocation2] sm:$0xff] %vm59_vm0, %v309_v0  ;;  %61 = vst.msk [vmem:[#allocation2 + $0x8] sm:$0xff] %vm59_vm0, %v309_v0  ;;  %v208_v2 = vld [vmem:[#allocation6 + $0x8] sm:$0xff]   ;;  %v209_v3 = vld [vmem:[#allocation3] sm:$0xff]   ;;  %vm158_vm2 = vcmask 257024   ;;  %s311_s2 = smov [#allocation9]  }
  0x39   :  { %192 = vmatpush3.bf16.msra.mxu0 %v207_v1  ;;  %v183_v12 = vld [vmem:[#allocation8] ss:$0 sm:$0xff]  ;;  %s166_s22 = sshll.u32 %s311_s2, 4  ;;  %s167_s22 = int_to_ptr.vmem [resolvable:$true] %s166_s22 }
  0x3a   :  { %193 = vmatprep.subr.bf16.mxu0 %v309_v0  ;;  %s276_s23 = scalar_lea.vmem %s167_s22, 128  ;;  %p281_p11 = scmp.lt.s32.totalorder %s167_s22, %s167_s22 }
  0x3b   :  { %p277_p10 = scmp.ne.s32.totalorder %s167_s22, %s276_s23  ;;  %p282_p12 = scmp.lt.s32.totalorder %s276_s23, %s276_s23 }
  0x3d   :  { %194 = vmatpush3.bf16.msra.mxu0 %v208_v2  ;;  %p283_p13 = por %p282_p12, %p281_p11 }
  0x3f   :  { %v62_v4 = vld [vmem:[#allocation2] sm:$0xff]  ;;  %v63_v6 = vld [vmem:[#allocation2 + $0x8] sm:$0xff]  ;;  %p284_p0 = pnand %p283_p13, %p277_p10 }
  0x40   :  { %196 = vmatmul.mubr.msk.bf16.vlgmr.msra.gmra.mrb[0].mxu0 %vm59_vm0, %v209_v3 }
 0x113   :  { %v125_v5 = vpop.f32.mrb[0].mxu0 }
 0x114   :  { %v132_v7 = vadd.f32 %v125_v5, %v62_v4  ;;  %v197_v8 = vpop.f32.mrb[1].mxu0 }
 0x115   :  { %v128_v9 = vpop.f32.mrb[2].mxu0 }
 0x116   :  { %134 = vst.msk [vmem:[#allocation2] sm:$0xff] %vm59_vm0, %v132_v7  ;;  %v133_v10 = vadd.f32 %v128_v9, %v63_v6  ;;  %v198_v11 = vpop.f32.mrb[3].mxu0 }
 0x118   :  { %135 = vst.msk [vmem:[#allocation2 + $0x8] sm:$0xff] %vm59_vm0, %v133_v10 }
 0x11d   :  { %v139_v13 = vld [vmem:[#allocation2] sm:$0xff] }
 0x11e   :  { %v148_v14 = vadd.f32 %v183_v12, %v139_v13 }
 0x11f   :  { %v140_v15 = vld [vmem:[#allocation2 + $0x8] sm:$0xff] }
 0x120   :  { %v149_v16 = vadd.f32 %v183_v12, %v140_v15  ;;  %v186_v17 = vpack.c.bf16 %v148_v14, %v148_v14 }
 0x122   :  { %v187_v18 = vpack.c.bf16 %v149_v16, %v149_v16  ;;  %159 = vst.msk [vmem:[#allocation9] sm:$0xf] %vm158_vm2, %v186_v17 }
 0x124   :  { %160 = vst.msk [vmem:[#allocation9 + $0x4] sm:$0xf] %vm158_vm2, %v187_v18 }
 0x125   :  { %287 = shalt.err (!%p284_p0)
}
 0x126   :  { %s288_s28 = scalar_lea.hbm %s404_s3, 128 }
 0x127   :  { %p289_p1 = scmp.ne.s32.totalorder %s404_s3, %s288_s28  ;;  %p292_p2 = scmp.lt.u32.totalorder %s288_s28, %s404_s3 }
 0x129   :  { %p294_p3 = pnand %p292_p2, %p289_p1 }
 0x12b   :  { %297 = shalt.err (!%p294_p3)
}
 0x12c   :  { %172 = dma.vmem_to_hbm [thread:$0]  %s167_s22, 128, %s404_s3, [#allocation5], %s306_s24, %s306_s24, %s307_s25  }
 0x12d   :  { %302 = dma.done.wait [#allocation5], 128  }
 0x12e   :  { %303 = vsyncadd [#allocation5], 4294967168 }
 0x12f   :  { %176 = vsyncpa [#allocation4], 1 }
 0x130   :  { %177 = vsyncpa [#allocation7], 1 }
 0x131   :  { %178 = vsyncpa [#allocation5], 1 }

</bundles_post_ra>
